<compile_context>
chip_gen: v6e
topology: v6e:2x2x1
jax: 0.10.0
libtpu: 0.0.40
codegen_flags: <defaults>
</compile_context>

<pallas_src>
import functools
import math

import jax
import jax.numpy as jnp
from jax.experimental import pallas as pl
from jax.experimental.pallas import tpu as pltpu

LANE = 128


def _round_up(v, m):
    return ((v + m - 1) // m) * m


def _vmem_limit_bytes(default=64 * 1024 * 1024):
    # ~85% of physical VMEM: ~108 MiB on v5e/v6e (128 MiB), ~54 MiB on v7x
    # (64 MiB) -- leaves headroom for double-buffering / compiler scratch.
    try:
        cap = getattr(pltpu.get_tpu_info(), "vmem_capacity_bytes", None)
        if cap:
            return int(cap * 0.85)
    except Exception:
        pass
    return default


# --------------------------------------------------------------------------- #
# Kernel 0: gene pre-pass, tiled over N.
#   out[:, :E] = relu(d_self_x * (x @ Wsx^T))     (SelfFeature-x, diag hoisted)
#   out[:, E:] = x @ Wty^T                        (linear_opposite_x, reused by
#                                                  Kernel A for Topo-y too)
# --------------------------------------------------------------------------- #
def gcn_gene_pre_kernel(x_ref, wsx_wty_ref, d_self_x_ref, out_ref, *, e_pad):
    f32, bf16 = jnp.float32, jnp.bfloat16
    fused = jnp.dot(x_ref[...], wsx_wty_ref[...], preferred_element_type=f32)
    self_x = jnp.maximum(d_self_x_ref[...] * fused[:, :e_pad], 0.0)
    out_ref[:, :e_pad] = self_x.astype(bf16)
    out_ref[:, e_pad:] = fused[:, e_pad:].astype(bf16)


# --------------------------------------------------------------------------- #
# Kernel A: sample (M) side, tiled over M rows.
# --------------------------------------------------------------------------- #
def gcn_sample_kernel(y_ref, lapt_ref, d_self_y_ref, b1_ref,
                      w1t_ref, wsy_wtx_ref, x_wty_ref, wlyt_ref,
                      ls_wtx_ref, ykt_ref, std_y_ref,
                      *, gamma, e_pad, k_dim, m_dim, tile_m):
    f32, bf16 = jnp.float32, jnp.bfloat16

    # linear1: tile of linear_sample = y @ W1^T + b1                (tile_m, Mp)
    linear_sample = jnp.dot(y_ref[...], w1t_ref[...],
                            preferred_element_type=f32) + b1_ref[...]

    # Fused shared-LHS matmul: linear_sample @ [Wsy^T | Wtx^T]      (tile_m, 2Ep)
    fused = jnp.dot(linear_sample.astype(bf16), wsy_wtx_ref[...],
                    preferred_element_type=f32)
    # Diagonal self-laplacian hoisted out of the MXU: D*(X@W) == (D*X)@W.
    self_y = jnp.maximum(d_self_y_ref[...] * fused[:, :e_pad], 0.0)
    lin_y = fused[:, e_pad:]                        # linear_sample @ Wtx^T

    # Topo-y via associativity: relu(lap^T @ (x @ Wty^T)) reuses Kernel 0's
    # output; flops ~ Mp*Np*Ep instead of Mp*Np*Mp + Mp*Mp*Ep and no (Mp,Mp)
    # f32 intermediate.
    coll_y = jnp.maximum(jnp.dot(lapt_ref[...], x_wty_ref[...],
                                 preferred_element_type=f32), 0.0)

    gcn_sample = self_y + coll_y
    sample_emb = (1.0 - gamma) * gcn_sample + gamma * (gcn_sample * lin_y)

    # Decoder projection (bf16 operands, f32 accumulate), mean-centered over the
    # real K columns; padded K columns and padded sample rows zeroed.
    yk = jnp.dot(sample_emb.astype(bf16), wlyt_ref[...],
                 preferred_element_type=f32)
    k_mask = jax.lax.broadcasted_iota(jnp.int32, (1, yk.shape[1]), 1) < k_dim
    yk_c = jnp.where(k_mask,
                     yk - jnp.sum(yk, axis=1, keepdims=True) * (1.0 / k_dim),
                     0.0)
    row = (jax.lax.broadcasted_iota(jnp.int32, (yk.shape[0], 1), 0)
           + pl.program_id(0) * tile_m)
    yk_c = jnp.where(row < m_dim, yk_c, 0.0)

    # Emit yk already transposed: one XLU transpose per (few) sample tiles
    # instead of a transposed-RHS contraction in every gene tile of Kernel B.
    ykt = yk_c.T                                    # (Kp, tile_m) f32
    ykt_ref[...] = ykt.astype(bf16)
    std_y_ref[...] = jnp.sqrt(jnp.sum(ykt * ykt, axis=0, keepdims=True))

    ls_wtx_ref[...] = lin_y.astype(bf16)            # reused by Kernel B (Topo-x)


# --------------------------------------------------------------------------- #
# Kernel B: gene (N) side main pass, tiled over N rows.
# --------------------------------------------------------------------------- #
def gcn_gene_kernel(lap_ref, sxlx_ref, ls_wtx_ref, wlxt_ref, ykt_ref, std_y_ref,
                    out_ref, *, gamma, e_pad, k_dim, alpha, min_v, inv_range):
    f32, bf16 = jnp.float32, jnp.bfloat16

    # Topo-x via associativity: relu(lap @ (linear_sample @ Wtx^T)).
    coll_x = jnp.maximum(jnp.dot(lap_ref[...], ls_wtx_ref[...],
                                 preferred_element_type=f32), 0.0)
    sxlx = sxlx_ref[...]
    self_x = sxlx[:, :e_pad].astype(f32)            # already scaled + relu'd (K0)
    lin_x = sxlx[:, e_pad:].astype(f32)             # x @ Wty^T

    gcn_gene = self_x + coll_x
    gene_emb = (1.0 - gamma) * gcn_gene + gamma * (gcn_gene * lin_x)

    # Decoder projection (bf16 operands, f32 accumulate) + mean centering.
    xk = jnp.dot(gene_emb.astype(bf16), wlxt_ref[...],
                 preferred_element_type=f32)
    k_mask = jax.lax.broadcasted_iota(jnp.int32, (1, xk.shape[1]), 1) < k_dim
    xk_c = jnp.where(k_mask,
                     xk - jnp.sum(xk, axis=1, keepdims=True) * (1.0 / k_dim),
                     0.0)

    # Correlation: plain (tile_n,Kp)@(Kp,Mp) bf16 matmul (yk pre-transposed).
    lxy = jnp.dot(xk_c.astype(bf16), ykt_ref[...], preferred_element_type=f32)
    std_x = jnp.sqrt(jnp.sum(xk_c * xk_c, axis=1, keepdims=True))
    denom = std_x * std_y_ref[...] + 1e-6           # matches reference epsilon
    corr = lxy * pl.reciprocal(denom, approx=True)

    # Scaled sigmoid.  Sigmoid is monotone, so the reference's pre-sigmoid clip
    # of corr to [-1,1] is equivalent to clamping the rescaled output to [0,1].
    s = jax.nn.sigmoid(alpha * corr)
    out_ref[...] = jnp.clip((s - min_v) * inv_range, 0.0, 1.0)


# --------------------------------------------------------------------------- #
# One-time preparation (matches the PyTorch module's __init__-time laplacians):
# degree vectors / diffuse laplacian in f32, lane-padded bf16 operands,
# transposed weights, fused weight concats.
# --------------------------------------------------------------------------- #
def prepare_gcn_inputs(adj, x, y, params, *, tile_n=256, tile_m=256):
    N, M = adj.shape
    E = params["wsx"].shape[0]
    K = params["wlx"].shape[0]
    assert tile_n % LANE == 0 and tile_m % LANE == 0, "tiles must be multiples of 128"
    n_pad = _round_up(N, tile_n)
    m_pad = _round_up(M, tile_m)
    e_pad = _round_up(E, LANE)
    k_pad = _round_up(K, LANE)

    f32, bf16 = jnp.float32, jnp.bfloat16
    adj_f = jnp.asarray(adj, f32)
    row_deg = jnp.sum(adj_f, axis=1)                       # (N,)  exact in f32
    col_deg = jnp.sum(adj_f, axis=0)                       # (M,)
    lap = (jax.lax.rsqrt(row_deg + 1.0)[:, None] * adj_f
           * jax.lax.rsqrt(col_deg + 1.0)[None, :])        # diffuse laplacian
    d_self_x = (1.0 / (row_deg + 1.0) + 1.0)[:, None]      # (N, 1)
    d_self_y = (1.0 / (col_deg + 1.0) + 1.0)[:, None]      # (M, 1)

    def pad2(a, rows, cols, dtype):
        a = jnp.asarray(a, dtype)
        return jnp.pad(a, ((0, rows - a.shape[0]), (0, cols - a.shape[1])))

    arrays = dict(
        lap=pad2(lap, n_pad, m_pad, bf16),      # adj streamed only as bf16 lap
        lap_t=pad2(lap.T, m_pad, n_pad, bf16),
        x=pad2(x, n_pad, m_pad, bf16),
        y=pad2(y, m_pad, n_pad, bf16),
        d_self_x=pad2(d_self_x, n_pad, 1, f32),
        d_self_y=pad2(d_self_y, m_pad, 1, f32),
        w1t=pad2(params["w1"].T, n_pad, m_pad, bf16),
        b1=jnp.pad(jnp.asarray(params["b1"], f32), (0, m_pad - M))[None, :],
        wsy_wtx=jnp.concatenate(
            [pad2(params["wsy"].T, m_pad, e_pad, bf16),
             pad2(params["wtx"].T, m_pad, e_pad, bf16)], axis=1),
        wsx_wty=jnp.concatenate(
            [pad2(params["wsx"].T, m_pad, e_pad, bf16),
             pad2(params["wty"].T, m_pad, e_pad, bf16)], axis=1),
        wlxt=pad2(params["wlx"].T, e_pad, k_pad, bf16),     # decoder -> bf16
        wlyt=pad2(params["wly"].T, e_pad, k_pad, bf16),
    )
    dims = dict(N=N, M=M, E=E, K=K, n_pad=n_pad, m_pad=m_pad,
                e_pad=e_pad, k_pad=k_pad, tile_n=tile_n, tile_m=tile_m)
    return arrays, dims


def graph_convolution_forward(arrays, dims, *, alpha=5.74, gamma=0.25):
    f32, bf16 = jnp.float32, jnp.bfloat16
    n_pad, m_pad = dims["n_pad"], dims["m_pad"]
    e_pad, k_pad = dims["e_pad"], dims["k_pad"]
    tile_n, tile_m = dims["tile_n"], dims["tile_m"]
    k_dim, m_dim = dims["K"], dims["M"]
    vmem = _vmem_limit_bytes()

    # ---- Kernel 0: gene pre-pass (x @ [Wsx^T | Wty^T], self half relu'd) ----
    sxlx = pl.pallas_call(
        functools.partial(gcn_gene_pre_kernel, e_pad=e_pad),
        out_shape=jax.ShapeDtypeStruct((n_pad, 2 * e_pad), bf16),
        grid=(n_pad // tile_n,),
        in_specs=[
            pl.BlockSpec((tile_n, m_pad), lambda i: (i, 0)),       # x tile
            pl.BlockSpec((m_pad, 2 * e_pad), lambda i: (0, 0)),    # [Wsx^T|Wty^T]
            pl.BlockSpec((tile_n, 1), lambda i: (i, 0)),           # d_self_x
        ],
        out_specs=pl.BlockSpec((tile_n, 2 * e_pad), lambda i: (i, 0)),
        compiler_params=pltpu.CompilerParams(
            dimension_semantics=("parallel",), vmem_limit_bytes=vmem),
    )(arrays["x"], arrays["wsx_wty"], arrays["d_self_x"])

    # ---- Kernel A: sample side, tiled over M ----
    sample_kernel = functools.partial(
        gcn_sample_kernel, gamma=float(gamma), e_pad=e_pad,
        k_dim=k_dim, m_dim=m_dim, tile_m=tile_m)
    ls_wtx, ykt, std_y = pl.pallas_call(
        sample_kernel,
        out_shape=(
            jax.ShapeDtypeStruct((m_pad, e_pad), bf16),     # linear_sample @ Wtx^T
            jax.ShapeDtypeStruct((k_pad, m_pad), bf16),     # centered yk^T
            jax.ShapeDtypeStruct((1, m_pad), f32),          # std_y
        ),
        grid=(m_pad // tile_m,),
        in_specs=[
            pl.BlockSpec((tile_m, n_pad), lambda i: (i, 0)),       # y tile
            pl.BlockSpec((tile_m, n_pad), lambda i: (i, 0)),       # lap^T tile
            pl.BlockSpec((tile_m, 1), lambda i: (i, 0)),           # d_self_y
            pl.BlockSpec((1, m_pad), lambda i: (0, 0)),            # b1
            pl.BlockSpec((n_pad, m_pad), lambda i: (0, 0)),        # W1^T (resident)
            pl.BlockSpec((m_pad, 2 * e_pad), lambda i: (0, 0)),    # [Wsy^T|Wtx^T]
            pl.BlockSpec((n_pad, e_pad), lambda i: (0, 1)),        # x @ Wty^T (K0, 2nd half)
            pl.BlockSpec((e_pad, k_pad), lambda i: (0, 0)),        # Wly^T
        ],
        out_specs=(
            pl.BlockSpec((tile_m, e_pad), lambda i: (i, 0)),
            pl.BlockSpec((k_pad, tile_m), lambda i: (0, i)),
            pl.BlockSpec((1, tile_m), lambda i: (0, i)),
        ),
        compiler_params=pltpu.CompilerParams(
            dimension_semantics=("parallel",), vmem_limit_bytes=vmem),
    )(arrays["y"], arrays["lap_t"], arrays["d_self_y"], arrays["b1"],
      arrays["w1t"], arrays["wsy_wtx"], sxlx, arrays["wlyt"])

    # ---- Kernel B: gene main pass, tiled over N ----
    max_v = 1.0 / (1.0 + math.exp(-float(alpha)))
    min_v = 1.0 / (1.0 + math.exp(float(alpha)))
    gene_kernel = functools.partial(
        gcn_gene_kernel, gamma=float(gamma), e_pad=e_pad, k_dim=k_dim,
        alpha=float(alpha), min_v=min_v, inv_range=1.0 / (max_v - min_v))
    out_pad = pl.pallas_call(
        gene_kernel,
        out_shape=jax.ShapeDtypeStruct((n_pad, m_pad), f32),
        grid=(n_pad // tile_n,),
        in_specs=[
            pl.BlockSpec((tile_n, m_pad), lambda i: (i, 0)),       # lap tile (bf16)
            pl.BlockSpec((tile_n, 2 * e_pad), lambda i: (i, 0)),   # [self_x | lin_x]
            pl.BlockSpec((m_pad, e_pad), lambda i: (0, 0)),        # linear_sample@Wtx^T
            pl.BlockSpec((e_pad, k_pad), lambda i: (0, 0)),        # Wlx^T
            pl.BlockSpec((k_pad, m_pad), lambda i: (0, 0)),        # yk^T
            pl.BlockSpec((1, m_pad), lambda i: (0, 0)),            # std_y
        ],
        out_specs=pl.BlockSpec((tile_n, m_pad), lambda i: (i, 0)),
        compiler_params=pltpu.CompilerParams(
            dimension_semantics=("parallel",), vmem_limit_bytes=vmem),
    )(arrays["lap"], sxlx, ls_wtx, arrays["wlxt"], ykt, std_y)

    return out_pad[:dims["N"], :dims["M"]]


# --------------------------------------------------------------------------- #
# Plain-JAX reference (direct transcription of the PyTorch module)
# --------------------------------------------------------------------------- #
def reference_forward(adj, x, y, params, *, alpha=5.74, gamma=0.25):
    def linear(inp, w, b=None):
        out = inp @ w.T
        return out if b is None else out + b

    linear_sample = linear(y, params["w1"], params["b1"])

    def self_laplace(a):
        d = 1.0 / (jnp.sum(a, axis=1) + 1.0)
        return jnp.diag(d + 1.0)

    def diffuse_laplace(a):
        d_x = jnp.diag((jnp.sum(a, axis=1) + 1.0) ** -0.5)
        d_y = jnp.diag((jnp.sum(a, axis=0) + 1.0) ** -0.5)
        return d_x @ a @ d_y

    self_x = jax.nn.relu(linear(self_laplace(adj) @ x, params["wsx"]))
    self_y = jax.nn.relu(linear(self_laplace(adj.T) @ linear_sample, params["wsy"]))

    lap_x = diffuse_laplace(adj)
    lap_y = diffuse_laplace(adj.T)
    collect_opposite_x = jax.nn.relu(linear(lap_x @ linear_sample, params["wtx"]))
    linear_opposite_y = linear(linear_sample, params["wtx"])
    collect_opposite_y = jax.nn.relu(linear(lap_y @ x, params["wty"]))
    linear_opposite_x = linear(x, params["wty"])

    gcn_gene = self_x + collect_opposite_x
    gcn_sample = self_y + collect_opposite_y
    gene_emb = (1 - gamma) * gcn_gene + gamma * (gcn_gene * linear_opposite_x)
    sample_emb = (1 - gamma) * gcn_sample + gamma * (gcn_sample * linear_opposite_y)

    xk = linear(gene_emb, params["wlx"])
    yk = linear(sample_emb, params["wly"])
    xk = xk - jnp.mean(xk, axis=1, keepdims=True)
    yk = yk - jnp.mean(yk, axis=1, keepdims=True)
    lxy = xk @ yk.T
    std = (jnp.sqrt(jnp.sum(xk * xk, axis=1))[:, None] *
           jnp.sqrt(jnp.sum(yk * yk, axis=1))[None, :])
    corr = jnp.clip(lxy / (std + 1e-6), -1.0, 1.0)
    s = jax.nn.sigmoid(alpha * corr)
    min_v = jax.nn.sigmoid(jnp.asarray(-alpha, jnp.float32))
    max_v = jax.nn.sigmoid(jnp.asarray(alpha, jnp.float32))
    return (s - min_v) / (max_v - min_v)


# --------------------------------------------------------------------------- #
# Deterministic parameter init (PyTorch nn.Linear default: U(-1/sqrt(in), ..))
# --------------------------------------------------------------------------- #
def init_linear(key, out_dim, in_dim, bias=False):
    kw, kb = jax.random.split(key)
    bound = 1.0 / math.sqrt(in_dim)
    w = jax.random.uniform(kw, (out_dim, in_dim), jnp.float32, -bound, bound)
    if bias:
        b = jax.random.uniform(kb, (out_dim,), jnp.float32, -bound, bound)
        return w, b
    return w, None


if __name__ == "__main__":
    # Small shapes consistent with the module: x: (N, M), y: (M, N), adj: (N, M).
    # Chosen so all three grids take >=2 steps at tile=128 (production default
    # is 256-row tiles; 128 is the MXU row count on v5e and still dense).
    N, M = 384, 256          # genes, samples
    E, K = 64, 32            # embed_dim, kernel_dim
    alpha, gamma = 5.74, 0.25

    root = jax.random.PRNGKey(0)
    k_adj, k_x, k_y, k1, k2, k3, k4, k5, k6, k7 = jax.random.split(root, 10)

    adj = (jax.random.uniform(k_adj, (N, M)) < 0.3).astype(jnp.float32)
    x_feature = jax.random.normal(k_x, (N, M), jnp.float32)
    y_feature = jax.random.normal(k_y, (M, N), jnp.float32)

    w1, b1 = init_linear(k1, M, N, bias=True)       # linear1: Linear(N, M)
    wsx, _ = init_linear(k2, E, M)                  # SelfFeature x : Linear(M, E)
    wsy, _ = init_linear(k3, E, M)                  # SelfFeature y : Linear(M, E)
    wtx, _ = init_linear(k4, E, M)                  # Topo x        : Linear(M, E)
    wty, _ = init_linear(k5, E, M)                  # Topo y        : Linear(M, E)
    wlx, _ = init_linear(k6, K, E)                  # decoder lm_x  : Linear(E, K)
    wly, _ = init_linear(k7, K, E)                  # decoder lm_y  : Linear(E, K)
    params = {"w1": w1, "b1": b1, "wsx": wsx, "wsy": wsy,
              "wtx": wtx, "wty": wty, "wlx": wlx, "wly": wly}

    # One-time prep (laplacians / degrees, transpose / pad / fuse / cast).
    arrays, dims = prepare_gcn_inputs(adj, x_feature, y_feature, params,
                                      tile_n=128, tile_m=128)

    out = graph_convolution_forward(arrays, dims, alpha=alpha, gamma=gamma)
    out = jax.block_until_ready(out)

    ref = jax.block_until_ready(
        reference_forward(adj, x_feature, y_feature, params, alpha=alpha, gamma=gamma))

    assert out.shape == (N, M) and out.dtype == jnp.float32
    max_err = float(jnp.max(jnp.abs(out - ref)))
    # bf16 MXU operands through the GCN + decoder + correlation matmuls (per
    # perf review) vs. an end-to-end f32 reference: expect ~2-4e-2 max abs
    # error on the scaled-sigmoid output; assert with a little headroom.
    assert max_err < 7.5e-2, f"mismatch vs reference, max abs err = {max_err}"

    print("KERNEL_OK")
</pallas_src>

<mosaic_0001>
module attributes {stable_mosaic.version = 11 : i64} {
  func.func @gcn_gene_pre_kernel(%arg0: i32, %arg1: memref<128x256xbf16, #tpu.memory_space<vmem>>, %arg2: memref<256x256xbf16, #tpu.memory_space<vmem>>, %arg3: memref<128x1xf32, #tpu.memory_space<vmem>>, %arg4: memref<128x256xbf16, #tpu.memory_space<vmem>>) attributes {dimension_semantics = [#tpu.dimension_semantics<parallel>], iteration_bounds = array<i64: 3>, scalar_prefetch = 0 : i64, scratch_operands = 0 : i64, tpu.core_type = #tpu.core_type<tc>, window_params = [{transform_indices = @transform_0, window_bounds = array<i64: 128, 256>}, {pipeline_mode = #tpu.pipeline_mode<synchronous>, transform_indices = @transform_1, window_bounds = array<i64: 256, 256>}, {transform_indices = @transform_2, window_bounds = array<i64: 128, 1>}, {transform_indices = @transform_3, window_bounds = array<i64: 128, 256>}]} {
    %c0 = arith.constant 0 : index
    %c0_0 = arith.constant 0 : index
    %0 = vector.load %arg1[%c0, %c0_0] : memref<128x256xbf16, #tpu.memory_space<vmem>>, vector<128x256xbf16>
    %c0_1 = arith.constant 0 : index
    %c0_2 = arith.constant 0 : index
    %1 = vector.load %arg2[%c0_1, %c0_2] : memref<256x256xbf16, #tpu.memory_space<vmem>>, vector<256x256xbf16>
    %cst = arith.constant dense<0.000000e+00> : vector<128x256xf32>
    %2 = tpu.matmul %0, %1, %cst {dimension_numbers = #tpu.dot_dimension_numbers<[1], [0], [0], [1], [0, 0, 1, 1], [], []>} : vector<128x256xbf16>, vector<256x256xbf16>, vector<128x256xf32> -> vector<128x256xf32>
    %c0_3 = arith.constant 0 : index
    %c0_4 = arith.constant 0 : index
    %3 = vector.load %arg3[%c0_3, %c0_4] : memref<128x1xf32, #tpu.memory_space<vmem>>, vector<128x1xf32>
    %4 = vector.extract_strided_slice %2 {offsets = [0, 0], sizes = [128, 128], strides = [1, 1]} : vector<128x256xf32> to vector<128x128xf32>
    %5 = vector.broadcast %3 : vector<128x1xf32> to vector<128x128xf32>
    %6 = arith.mulf %5, %4 : vector<128x128xf32>
    %cst_5 = arith.constant 0.000000e+00 : f32
    %7 = vector.broadcast %cst_5 : f32 to vector<128x128xf32>
    %8 = arith.maximumf %6, %7 : vector<128x128xf32>
    %9 = arith.truncf %8 : vector<128x128xf32> to vector<128x128xbf16>
    %c0_6 = arith.constant 0 : index
    %c0_7 = arith.constant 0 : index
    %10 = vector.load %arg4[%c0_6, %c0_7] : memref<128x256xbf16, #tpu.memory_space<vmem>>, vector<128x128xbf16>
    tpu.vector_store %arg4[%c0_6, %c0_7], %9 {strides = array<i32>} : memref<128x256xbf16, #tpu.memory_space<vmem>>, vector<128x128xbf16>,
    %11 = vector.extract_strided_slice %2 {offsets = [0, 128], sizes = [128, 128], strides = [1, 1]} : vector<128x256xf32> to vector<128x128xf32>
    %12 = arith.truncf %11 : vector<128x128xf32> to vector<128x128xbf16>
    %c0_8 = arith.constant 0 : index
    %c128 = arith.constant 128 : index
    %13 = vector.load %arg4[%c0_8, %c128] : memref<128x256xbf16, #tpu.memory_space<vmem>>, vector<128x128xbf16>
    tpu.vector_store %arg4[%c0_8, %c128], %12 {strides = array<i32>} : memref<128x256xbf16, #tpu.memory_space<vmem>>, vector<128x128xbf16>,
    return
  }
  func.func @transform_0(%arg0: i32) -> (i32, i32) {
    %c0_i32 = arith.constant 0 : i32
    %c0_i32_0 = arith.constant 0 : i32
    return %arg0, %c0_i32 : i32, i32
  }
  func.func @transform_1(%arg0: i32) -> (i32, i32) {
    %c0_i32 = arith.constant 0 : i32
    %c0_i32_0 = arith.constant 0 : i32
    %c0_i32_1 = arith.constant 0 : i32
    return %c0_i32, %c0_i32_0 : i32, i32
  }
  func.func @transform_2(%arg0: i32) -> (i32, i32) {
    %c0_i32 = arith.constant 0 : i32
    %c0_i32_0 = arith.constant 0 : i32
    return %arg0, %c0_i32 : i32, i32
  }
  func.func @transform_3(%arg0: i32) -> (i32, i32) {
    %c0_i32 = arith.constant 0 : i32
    %c0_i32_0 = arith.constant 0 : i32
    return %arg0, %c0_i32 : i32, i32
  }
}

</mosaic_0001>

<bundles_post_ra>
// kernel: tpu_custom_call.1
= control target key start
LH: loop header
LB: loop body
LE: loop exit
PB: predicated region body
PF: predicated region fallthrough
CT: control target
= control target key end

     0   :  { %8 = vsyncpa [#allocation3], 0  ;;  %s1627_s0 = inlined_call_operand.vmem [shape: bf16[384,256], index: 0, kind: input, shape index: {}]   ;;  %s1628_s1 = inlined_call_operand.hbm [shape: bf16[256,256], index: 1, kind: input, shape index: {}]   ;;  %s1629_s2 = inlined_call_operand.vmem [shape: f32[384,1], index: 2, kind: input, shape index: {}]   ;;  %s1630_s3 = inlined_call_operand.hbm [shape: bf16[384,256], index: 3, kind: output, shape index: {}]  }
   0x1   :  { %9 = vsyncpa [#allocation4], 0 }
   0x2   :  { %11 = vsyncpa [#allocation4 + $0x1], 0  ;;  %s1415_s12 = smov 0   ;;  %s1417_s13 = smov 0  }
   0x3   :  { %s1419_s14 = smov 0   ;;  %s1421_s15 = smov 0  }
   0x4 LB: > { %s1436_s16 = sadd.s32 4294967295, %s1386_s15   ;;  %s1002_s17 = sadd.s32 4294967294, %s1386_s15   ;;  %s1386_s15 = sphi %s1421_s15, %s1638_s15   ;;  %s1382_s14 = sphi %s1419_s14, %s1637_s14   ;;  %s1378_s13 = sphi %s1417_s13, %s1636_s13   ;;  %s1374_s12 = sphi %s1415_s12, %s1635_s12  }
   0x5   : > { %s1440_s18 = sadd.s32 1, %s1386_s15   ;;  %s97_s19 = sadd.s32 1, %s1382_s14 }
   0x6   : > { %s94_s20 = ssub.s32 %s1386_s15, %s1440_s18  ;;  %p107_p0 = scmp.ne.s32.totalorder %s1382_s14, %s1378_s13 }
   0x7   : > { %p95_p1 = scmp.eq.s32.totalorder %s94_s20, 0  ;;  %p108_p2 = scmp.eq.s32.totalorder %s1436_s16, 2 }
   0x8   : > { %p113_p3 = scmp.ne.s32.totalorder %s1378_s13, %s1374_s12  ;;  %p114_p4 = scmp.eq.s32.totalorder %s1002_s17, 2 }
   0x9   : > { %s1451_s21 = scalar_select %p95_p1, %s1382_s14, %s97_s19  }
   0xa   : > { %p1453_p5 = por %p108_p2, %p107_p0  ;;  %p1457_p6 = por %p114_p4, %p113_p3 }
   0xb   : > { %p1003_p7 = scmp.ge.s32.totalorder %s1386_s15, 1  ;;  %p121_p8 = scmp.lt.s32.totalorder %s1386_s15, 4 }
   0xc   : > { %s1632_s23 = scalar_select %p1457_p6, 1, 0 }
   0xd   : > { %p1181_p9 = scmp.eq.s32.totalorder %s1436_s16, 0  ;;  %p1464_p10 = pnand %p1003_p7, %p121_p8 }
   0xe   : > { %s1388_s25 = smov [#allocation2]  }
   0xf   : > { %s133_s26 = sshll.u32 %s1388_s25, 4  ;;  %p1173_p11 = pneg %p1464_p10  ;;  %s134_s26 = int_to_ptr.vmem [resolvable:$true] %s133_s26 }
  0x10   : > { %s1307_s27 = scalar_lea.vmem %s134_s26, 4096  ;;  %p1315_p3 = scmp.lt.s32.totalorder %s134_s26, %s134_s26 }
  0x11   : > { %p1174_p12 = pnand %p1181_p9, %p1173_p11  ;;  %p1308_p0 = scmp.ne.s32.totalorder %s134_s26, %s1307_s27 }
  0x12   : > { %p1316_p4 = scmp.lt.s32.totalorder %s1307_s27, %s1307_s27 }
  0x13   : > { %p1298_p13 = pneg %p1174_p12 }
  0x14   : > { %p1317_p6 = por %p1316_p4, %p1315_p3 }
  0x15   : > { %p1310_p1 = pnand %p1308_p0, %p1298_p13 }
  0x17   : > { %p1311_p2 = pneg %p1310_p1 }
  0x19   : > { %p1318_p7 = pnand %p1317_p6, %p1311_p2 }
  0x1b   : > { %1321 = shalt.err (!%p1318_p7)
}
  0x1c   : > { %s1389_s28 = smov 128   ;;  %s1390_s29 = smov 8  }
  0x1d   : > { %1176 = dma.hbm_to_vmem [thread:$0]  (!%p1174_p12), %s1628_s1, 4096, %s134_s26, [#allocation3], %s1389_s28, %s1389_s28, %s1390_s29  }
  0x1e   : > { %168 = sbr.rel (%p1464_p10) target bundleno = 344 (0x158), region = 32 }
  0x23   : > { %1365 = dma.done.wait (%p1181_p9), [#allocation3], 4096  }
  0x24   : > { %1367 = vsyncadd (%p1181_p9), [#allocation3], 4294963200  ;;  %v1391_v0 = vmov 0   ;;  %v1224_v1 = vld [vmem:[#allocation2 + $0x74] ss:$8 sps:$4 sm:$0xff]   ;;  %s1009_s5 = sshll.u32 %s1436_s16, 4 }
  0x25   : > { %1223 = vset.pattern.permute.xlu1 %v1391_v0  ;;  %1222 = vset.pattern.permute.xlu0 %v1391_v0  ;;  %v1226_v2 = vld [vmem:[#allocation2 + $0x70] ss:$8 sps:$4 sm:$0xff]   ;;  %v1227_v3 = vld [vmem:[#allocation2 + $0x64] ss:$8 sps:$4 sm:$0xff]   ;;  %v1229_v4 = vld [vmem:[#allocation2 + $0x60] ss:$8 sps:$4 sm:$0xff]  }
  0x26   : > { %500 = vmatprep.subr.bf16.mxu0 %v1224_v1  ;;  %1135 = vmatprep.subr.bf16.mxu1 %v1224_v1  ;;  %v1230_v5 = vld [vmem:[#allocation2 + $0x54] ss:$8 sps:$4 sm:$0xff]   ;;  %v1232_v6 = vld [vmem:[#allocation2 + $0x50] ss:$8 sps:$4 sm:$0xff]   ;;  %v1233_v7 = vld [vmem:[#allocation2 + $0x44] ss:$8 sps:$4 sm:$0xff]  }
  0x27   : > { %501 = vmatpush1.bf16.msra.mxu0 %v1226_v2  ;;  %1151 = vmatpush1.bf16.msra.mxu1 %v1226_v2  ;;  %p199_p6 = scmp.lt.s32.totalorder %s1009_s5, 47  ;;  %v1235_v8 = vld [vmem:[#allocation2 + $0x40] ss:$8 sps:$4 sm:$0xff]   ;;  %v1236_v9 = vld [vmem:[#allocation2 + $0x34] ss:$8 sps:$4 sm:$0xff]   ;;  %s195_s19 = sand.u32 1, %s1378_s13  }
  0x28   : > { %502 = vmatprep.subr.bf16.mxu0 %v1227_v3  ;;  %1136 = vmatprep.subr.bf16.mxu1 %v1227_v3  ;;  %v1238_v10 = vld [vmem:[#allocation2 + $0x30] ss:$8 sps:$4 sm:$0xff]   ;;  %v1239_v11 = vld [vmem:[#allocation2 + $0x24] ss:$8 sps:$4 sm:$0xff]   ;;  %v1241_v12 = vld [vmem:[#allocation2 + $0x20] ss:$8 sps:$4 sm:$0xff]  }
  0x29   : > { %s1640_s5 = smov (!%p199_p6, %s1009_s5), 47  ;;  %v1242_v13 = vld [vmem:[#allocation2 + $0x14] ss:$8 sps:$4 sm:$0xff]   ;;  %v1244_v15 = vld [vmem:[#allocation2 + $0x10] ss:$8 sps:$4 sm:$0xff]   ;;  %s1008_s20 = sshll.u32 %s195_s19, 7 }
  0x2a   : > { %s1100_s6 = sshll.u32 %s1640_s5, 3  ;;  %v1245_v17 = vld [vmem:[#allocation2 + $0x4] ss:$8 sps:$4 sm:$0xff]   ;;  %v1247_v18 = vld [vmem:[#allocation2] ss:$8 sps:$4 sm:$0xff]   ;;  %s1538_s24 = scalar_lea.vmem [#allocation5], %s1008_s20 }
  0x2b   : > { %503 = vmatpush1.bf16.msra.mxu0 %v1229_v4  ;;  %1152 = vmatpush1.bf16.msra.mxu1 %v1229_v4  ;;  %s1488_s9 = scalar_lea.vmem %s1627_s0, %s1100_s6  ;;  %v1248_v19 = vld [vmem:[#allocation2 + $0xf4] ss:$8 sps:$4 sm:$0xff]   ;;  %s1495_s17 = scalar_lea.vmem %s1629_s2, %s1100_s6  ;;  %v1250_v20 = vld [vmem:[#allocation2 + $0xf0] ss:$8 sps:$4 sm:$0xff]   ;;  %v1251_v21 = vld [vmem:[#allocation2 + $0xe4] ss:$8 sps:$4 sm:$0xff]  }
  0x2c   : > { %504 = vmatprep.subr.bf16.mxu0 %v1230_v5  ;;  %1137 = vmatprep.subr.bf16.mxu1 %v1230_v5  ;;  %v1274_v14 = vld [vmem:[%s1488_s9 + $0x4] ss:$8 sps:$4 sm:$0xff]   ;;  %v615_v22 = vld [vmem:[%s1495_s17 + $0x10] sm:$0xff]  ;;  %v616_v24 = vld [vmem:[%s1495_s17 + $0x18] sm:$0xff]  ;;  %s1134_s25 = sshll.u32 %s1436_s16, 11  ;;  %s916_s26 = sshll.u32 %s1538_s24, 4  ;;  %s1579_s26 = int_to_ptr.vmem [resolvable:$true] %s916_s26 }
  0x2d   : > { %v1277_v16 = vld [vmem:[%s1488_s9 + $0x44] ss:$8 sps:$4 sm:$0xff]   ;;  %532 = vmatprep.mubr.bf16.mxu0 %v1274_v14  ;;  %641 = vperm.xlu1 %1223, %v615_v22   ;;  %v1253_v26 = vld [vmem:[#allocation2 + $0xe0] ss:$8 sps:$4 sm:$0xff]   ;;  %v1254_v27 = vld [vmem:[#allocation2 + $0xd4] ss:$8 sps:$4 sm:$0xff]   ;;  %s1577_s29 = scalar_lea.hbm %s1630_s3, %s1134_s25 }
  0x2e   : > { %572 = vmatprep.mubr.bf16.mxu1 %v1277_v16  ;;  %v613_v23 = vld [vmem:[%s1495_s17] sm:$0xff]  ;;  %v614_v25 = vld [vmem:[%s1495_s17 + $0x8] sm:$0xff]  ;;  %v1256_v30 = vld [vmem:[#allocation2 + $0xd0] ss:$8 sps:$4 sm:$0xff]   ;;  %s1587_s16 = scalar_lea.sflag [#allocation4], %s195_s19  ;;  %s1322_s30 = scalar_lea.vmem %s1579_s26, 2048 }
  0x2f   : > { %505 = vmatpush1.bf16.msra.mxu0 %v1232_v6  ;;  %1153 = vmatpush1.bf16.msra.mxu1 %v1232_v6  ;;  %v618_v28 = vld [vmem:[%s1495_s17 + $0x28] sm:$0xff]  ;;  %v617_v29 = vld [vmem:[%s1495_s17 + $0x20] sm:$0xff]  ;;  %v620_v32 = vld [vmem:[%s1495_s17 + $0x38] sm:$0xff]  ;;  %p1323_p8 = scmp.ne.s32.totalorder %s1579_s26, %s1322_s30  ;;  %s1392_s4 = smov [#allocation5]  }
  0x30   : > { %506 = vmatprep.subr.bf16.mxu0 %v1233_v7  ;;  %1138 = vmatprep.subr.bf16.mxu1 %v1233_v7  ;;  %v1257_v31 = vld [vmem:[#allocation2 + $0xc4] ss:$8 sps:$4 sm:$0xff]   ;;  %v619_v33 = vld [vmem:[%s1495_s17 + $0x30] sm:$0xff]  ;;  %v1259_v34 = vld [vmem:[#allocation2 + $0xc0] ss:$8 sps:$4 sm:$0xff]   ;;  %s1326_s5 = sshll.u32 %s1392_s4, 4  ;;  %s1327_s5 = int_to_ptr.vmem [resolvable:$false] %s1326_s5 }
  0x31   : > { %631 = vperm.xlu0 %1222, %v613_v23   ;;  %646 = vperm.xlu1 %1223, %v616_v24   ;;  %v1260_v35 = vld [vmem:[#allocation2 + $0xb4] ss:$8 sps:$4 sm:$0xff]   ;;  %v622_v36 = vld [vmem:[%s1495_s17 + $0x48] sm:$0xff]  ;;  %v621_v37 = vld [vmem:[%s1495_s17 + $0x40] sm:$0xff]  ;;  %p1324_p9 = pnand %p1323_p8, %p1453_p5  ;;  %s1328_s6 = scalar_lea.vmem %s1327_s5, 4096 }
  0x32   : > { %v1262_v38 = vld [vmem:[#allocation2 + $0xb0] ss:$8 sps:$4 sm:$0xff]   ;;  %v1263_v39 = vld [vmem:[#allocation2 + $0xa4] ss:$8 sps:$4 sm:$0xff]   ;;  %v1265_v42 = vld [vmem:[#allocation2 + $0xa0] ss:$8 sps:$4 sm:$0xff]   ;;  %p1329_p11 = scmp.lt.s32.totalorder %s1579_s26, %s1327_s5  ;;  %p1330_p12 = scmp.lt.s32.totalorder %s1328_s6, %s1322_s30 }
  0x33   : > { %507 = vmatpush1.bf16.msra.mxu0 %v1235_v8  ;;  %1154 = vmatpush1.bf16.msra.mxu1 %v1235_v8  ;;  %v624_v40 = vld [vmem:[%s1495_s17 + $0x58] sm:$0xff]  ;;  %v623_v41 = vld [vmem:[%s1495_s17 + $0x50] sm:$0xff]  ;;  %v626_v44 = vld [vmem:[%s1495_s17 + $0x68] sm:$0xff]  ;;  %p1325_p10 = pneg %p1324_p9 }
  0x34   : > { %508 = vmatprep.subr.bf16.mxu0 %v1236_v9  ;;  %1139 = vmatprep.subr.bf16.mxu1 %v1236_v9  ;;  %v1266_v43 = vld [vmem:[#allocation2 + $0x94] ss:$8 sps:$4 sm:$0xff]   ;;  %v625_v45 = vld [vmem:[%s1495_s17 + $0x60] sm:$0xff]  ;;  %v1268_v46 = vld [vmem:[#allocation2 + $0x90] ss:$8 sps:$4 sm:$0xff]   ;;  %p1331_p13 = por %p1330_p12, %p1329_p11 }
  0x35   : > { %636 = vperm.xlu0 %1222, %v614_v25   ;;  %656 = vperm.xlu1 %1223, %v618_v28   ;;  %v1269_v47 = vld [vmem:[#allocation2 + $0x84] ss:$8 sps:$4 sm:$0xff]   ;;  %v628_v48 = vld [vmem:[%s1495_s17 + $0x78] sm:$0xff]  ;;  %v627_v49 = vld [vmem:[%s1495_s17 + $0x70] sm:$0xff] }
  0x36   : > { %v1271_v50 = vld [vmem:[#allocation2 + $0x80] ss:$8 sps:$4 sm:$0xff]   ;;  %v1278_v53 = vld [vmem:[%s1488_s9 + $0x14] ss:$8 sps:$4 sm:$0xff]   ;;  %v1282_v55 = vld [vmem:[%s1488_s9 + $0x10] ss:$8 sps:$4 sm:$0xff]   ;;  %p1332_p0 = pnand %p1331_p13, %p1325_p10 }
  0x37   : > { %509 = vmatpush1.bf16.msra.mxu0 %v1238_v10  ;;  %1155 = vmatpush1.bf16.msra.mxu1 %v1238_v10  ;;  %v1272_v51 = vld [vmem:[%s1488_s9] ss:$8 sps:$4 sm:$0xff]   ;;  %v1280_v54 = vld [vmem:[%s1488_s9 + $0x54] ss:$8 sps:$4 sm:$0xff]   ;;  %v1283_v56 = vld [vmem:[%s1488_s9 + $0x50] ss:$8 sps:$4 sm:$0xff]  }
  0x38   : > { %510 = vmatprep.subr.bf16.mxu0 %v1239_v11  ;;  %1140 = vmatprep.subr.bf16.mxu1 %v1239_v11  ;;  %v1275_v52 = vld [vmem:[%s1488_s9 + $0x40] ss:$8 sps:$4 sm:$0xff]   ;;  %v1284_v57 = vld [vmem:[%s1488_s9 + $0x24] ss:$8 sps:$4 sm:$0xff]   ;;  %v1290_v61 = vld [vmem:[%s1488_s9 + $0x34] ss:$8 sps:$4 sm:$0xff]  }
  0x39   : > { %651 = vperm.xlu0 %1222, %v617_v29   ;;  %666 = vperm.xlu1 %1223, %v620_v32   ;;  %v1286_v58 = vld [vmem:[%s1488_s9 + $0x64] ss:$8 sps:$4 sm:$0xff]   ;;  %v1288_v59 = vld [vmem:[%s1488_s9 + $0x20] ss:$8 sps:$4 sm:$0xff]   ;;  %v1292_v62 = vld [vmem:[%s1488_s9 + $0x74] ss:$8 sps:$4 sm:$0xff]  }
  0x3a   : > { %v1289_v60 = vld [vmem:[%s1488_s9 + $0x60] ss:$8 sps:$4 sm:$0xff]   ;;  %v1294_v63 = vld [vmem:[%s1488_s9 + $0x30] ss:$8 sps:$4 sm:$0xff]  }
  0x3b   : > { %511 = vmatpush1.bf16.msra.mxu0 %v1241_v12  ;;  %1156 = vmatpush1.bf16.msra.mxu1 %v1241_v12  ;;  %v1295_v0 = vld [vmem:[%s1488_s9 + $0x70] ss:$8 sps:$4 sm:$0xff]  }
  0x3c   : > { %512 = vmatprep.subr.bf16.mxu0 %v1242_v13  ;;  %1141 = vmatprep.subr.bf16.mxu1 %v1242_v13 }
  0x3d   : > { %661 = vperm.xlu0 %1222, %v619_v33   ;;  %676 = vperm.xlu1 %1223, %v622_v36  }
  0x3f   : > { %513 = vmatpush1.bf16.msra.mxu0 %v1244_v15  ;;  %1157 = vmatpush1.bf16.msra.mxu1 %v1244_v15 }
  0x40   : > { %514 = vmatprep.subr.bf16.mxu0 %v1245_v17  ;;  %1142 = vmatprep.subr.bf16.mxu1 %v1245_v17 }
  0x41   : > { %671 = vperm.xlu0 %1222, %v621_v37   ;;  %686 = vperm.xlu1 %1223, %v624_v40  }
  0x43   : > { %515 = vmatpush1.bf16.msra.mxu0 %v1247_v18  ;;  %1158 = vmatpush1.bf16.msra.mxu1 %v1247_v18 }
  0x44   : > { %516 = vmatprep.subr.bf16.mxu0 %v1248_v19  ;;  %1143 = vmatprep.subr.bf16.mxu1 %v1248_v19 }
  0x45   : > { %681 = vperm.xlu0 %1222, %v623_v41   ;;  %696 = vperm.xlu1 %1223, %v626_v44  }
  0x47   : > { %517 = vmatpush2.bf16.msra.mxu0 %v1250_v20  ;;  %1159 = vmatpush2.bf16.msra.mxu1 %v1250_v20 }
  0x48   : > { %518 = vmatprep.subr.bf16.mxu0 %v1251_v21  ;;  %1144 = vmatprep.subr.bf16.mxu1 %v1251_v21 }
  0x49   : > { %691 = vperm.xlu0 %1222, %v625_v45   ;;  %706 = vperm.xlu1 %1223, %v628_v48  }
  0x4b   : > { %519 = vmatpush2.bf16.msra.mxu0 %v1253_v26  ;;  %1160 = vmatpush2.bf16.msra.mxu1 %v1253_v26 }
  0x4c   : > { %520 = vmatprep.subr.bf16.mxu0 %v1254_v27  ;;  %1145 = vmatprep.subr.bf16.mxu1 %v1254_v27 }
  0x4d   : > { %701 = vperm.xlu0 %1222, %v627_v49  }
  0x4f   : > { %521 = vmatpush2.bf16.msra.mxu0 %v1256_v30  ;;  %1161 = vmatpush2.bf16.msra.mxu1 %v1256_v30 }
  0x50   : > { %522 = vmatprep.subr.bf16.mxu0 %v1257_v31  ;;  %1146 = vmatprep.subr.bf16.mxu1 %v1257_v31 }
  0x53   : > { %523 = vmatpush2.bf16.msra.mxu0 %v1259_v34  ;;  %1162 = vmatpush2.bf16.msra.mxu1 %v1259_v34 }
  0x54   : > { %524 = vmatprep.subr.bf16.mxu0 %v1260_v35  ;;  %1147 = vmatprep.subr.bf16.mxu1 %v1260_v35 }
  0x57   : > { %525 = vmatpush2.bf16.msra.mxu0 %v1262_v38  ;;  %1163 = vmatpush2.bf16.msra.mxu1 %v1262_v38 }
  0x58   : > { %526 = vmatprep.subr.bf16.mxu0 %v1263_v39  ;;  %1148 = vmatprep.subr.bf16.mxu1 %v1263_v39 }
  0x5b   : > { %527 = vmatpush2.bf16.msra.mxu0 %v1265_v42  ;;  %1164 = vmatpush2.bf16.msra.mxu1 %v1265_v42 }
  0x5c   : > { %528 = vmatprep.subr.bf16.mxu0 %v1266_v43  ;;  %1149 = vmatprep.subr.bf16.mxu1 %v1266_v43 }
  0x5f   : > { %529 = vmatpush2.bf16.msra.mxu0 %v1268_v46  ;;  %1165 = vmatpush2.bf16.msra.mxu1 %v1268_v46 }
  0x60   : > { %530 = vmatprep.subr.bf16.mxu0 %v1269_v47  ;;  %1150 = vmatprep.subr.bf16.mxu1 %v1269_v47 }
  0x63   : > { %531 = vmatpush2.bf16.msra.mxu0 %v1271_v50  ;;  %1166 = vmatpush2.bf16.msra.mxu1 %v1271_v50 }
  0x66   : > { %533 = vmatmul.mubr.bf16.vlgmr.msra.gmra.mxu0 %v1272_v51  ;;  %573 = vmatmul.mubr.bf16.vlgmr.msra.gmra.mxu1 %v1275_v52 }
  0x67   : > { %542 = vmatprep.mubr.bf16.mxu0 %v1278_v53  ;;  %582 = vmatprep.mubr.bf16.mxu1 %v1280_v54 }
  0x6e   : > { %543 = vmatmul.mubr.bf16.gmra.mxu0 %v1282_v55  ;;  %583 = vmatmul.mubr.bf16.gmra.mxu1 %v1283_v56 }
  0x6f   : > { %552 = vmatprep.mubr.bf16.mxu0 %v1284_v57  ;;  %592 = vmatprep.mubr.bf16.mxu1 %v1286_v58 }
  0x76   : > { %553 = vmatmul.mubr.bf16.gmra.mxu0 %v1288_v59  ;;  %593 = vmatmul.mubr.bf16.gmra.mxu1 %v1289_v60 }
  0x77   : > { %562 = vmatprep.mubr.bf16.mxu0 %v1290_v61  ;;  %602 = vmatprep.mubr.bf16.mxu1 %v1292_v62 }
  0x7e   : > { %563 = vmatmul.mubr.bf16.gmra.mxu0 %v1294_v63  ;;  %603 = vmatmul.mubr.bf16.gmra.mxu1 %v1295_v0 }
  0xa8   : > { %v642_v2 = vpop.permute.xlu1 %641 }
  0xac   : > { %v632_v1 = vpop.permute.xlu0 %631  ;;  %v647_v4 = vpop.permute.xlu1 %646 }
  0xb0   : > { %v637_v3 = vpop.permute.xlu0 %636  ;;  %v1529_v6 = vpop.permute.xlu1 %656 }
  0xb4   : > { %v1527_v5 = vpop.permute.xlu0 %651  ;;  %v1534_v8 = vpop.permute.xlu1 %666 }
  0xb8   : > { %v1531_v7 = vpop.permute.xlu0 %661  ;;  %v677_v16 = vpop.permute.xlu1 %676 }
  0xbc   : > { %v672_v9 = vpop.permute.xlu0 %671  ;;  %v687_v42 = vpop.permute.xlu1 %686 }
  0xc0   : > { %v682_v29 = vpop.permute.xlu0 %681 }
  0xc4   : > { %v692_v55 = vpop.permute.xlu0 %691 }
 0x126   : > { %v534_v10 = vpop.f32.mrf.mxu0  ;;  %v574_v11 = vpop.f32.mrf.mxu1 }
 0x127   : > { %v709_v12 = vmul.f32 %v632_v1, %v534_v10  ;;  %v717_v13 = vmul.f32 %v672_v9, %v574_v11 }
 0x128   : > { %v536_v14 = vpop.f32.mrf.mxu0  ;;  %v576_v15 = vpop.f32.mrf.mxu1 }
 0x129   : > { %v725_v17 = vmax.f32 %v709_v12, 0.0  ;;  %v733_v18 = vmax.f32 %v717_v13, 0.0  ;;  %v1117_v19 = vpack.c.bf16 %v536_v14, %v536_v14  ;;  %v1125_v20 = vpack.c.bf16 %v576_v15, %v576_v15 }
 0x12a   : > { %v538_v21 = vpop.f32.mrf.mxu0  ;;  %v578_v22 = vpop.f32.mrf.mxu1 }
 0x12b   : > { %v1101_v23 = vpack.c.bf16 %v725_v17, %v725_v17  ;;  %v1109_v24 = vpack.c.bf16 %v733_v18, %v733_v18  ;;  %885 = vst [vmem:[%s1538_s24 + $0x4] sm:$0xf] %v1117_v19  ;;  %893 = vst [vmem:[%s1538_s24 + $0x44] sm:$0xf] %v1125_v20  ;;  %v710_v25 = vmul.f32 %v637_v3, %v538_v21  ;;  %v702_v20 = vpop.permute.xlu0 %701 }
 0x12c   : > { %v718_v26 = vmul.f32 %v677_v16, %v578_v22  ;;  %v540_v27 = vpop.f32.mrf.mxu0  ;;  %v580_v28 = vpop.f32.mrf.mxu1 }
 0x12d   : > { %805 = vst [vmem:[%s1538_s24] sm:$0xf] %v1101_v23  ;;  %813 = vst [vmem:[%s1538_s24 + $0x40] sm:$0xf] %v1109_v24  ;;  %v726_v30 = vmax.f32 %v710_v25, 0.0  ;;  %v1118_v32 = vpack.c.bf16 %v540_v27, %v540_v27  ;;  %v1126_v33 = vpack.c.bf16 %v580_v28, %v580_v28 }
 0x12e   : > { %v734_v31 = vmax.f32 %v718_v26, 0.0  ;;  %v544_v34 = vpop.f32.mrf.mxu0  ;;  %v584_v35 = vpop.f32.mrf.mxu1 }
 0x12f   : > { %v1102_v36 = vpack.c.bf16 %v726_v30, %v726_v30  ;;  %886 = vst [vmem:[%s1538_s24 + $0xc] sm:$0xf] %v1118_v32  ;;  %894 = vst [vmem:[%s1538_s24 + $0x4c] sm:$0xf] %v1126_v33  ;;  %v711_v38 = vmul.f32 %v642_v2, %v544_v34  ;;  %v719_v39 = vmul.f32 %v682_v29, %v584_v35 }
 0x130   : > { %v1110_v37 = vpack.c.bf16 %v734_v31, %v734_v31  ;;  %v546_v40 = vpop.f32.mrf.mxu0  ;;  %v586_v41 = vpop.f32.mrf.mxu1 }
 0x131   : > { %806 = vst [vmem:[%s1538_s24 + $0x8] sm:$0xf] %v1102_v36  ;;  %v727_v43 = vmax.f32 %v711_v38, 0.0  ;;  %v735_v44 = vmax.f32 %v719_v39, 0.0  ;;  %v1119_v45 = vpack.c.bf16 %v546_v40, %v546_v40  ;;  %v1127_v46 = vpack.c.bf16 %v586_v41, %v586_v41 }
 0x132   : > { %814 = vst [vmem:[%s1538_s24 + $0x48] sm:$0xf] %v1110_v37  ;;  %v548_v47 = vpop.f32.mrf.mxu0  ;;  %v588_v48 = vpop.f32.mrf.mxu1 }
 0x133   : > { %v1103_v49 = vpack.c.bf16 %v727_v43, %v727_v43  ;;  %v1111_v50 = vpack.c.bf16 %v735_v44, %v735_v44  ;;  %887 = vst [vmem:[%s1538_s24 + $0x14] sm:$0xf] %v1119_v45  ;;  %895 = vst [vmem:[%s1538_s24 + $0x54] sm:$0xf] %v1127_v46  ;;  %v712_v51 = vmul.f32 %v647_v4, %v548_v47  ;;  %v697_v4 = vpop.permute.xlu1 %696 }
 0x134   : > { %v720_v52 = vmul.f32 %v687_v42, %v588_v48  ;;  %v550_v53 = vpop.f32.mrf.mxu0  ;;  %v590_v54 = vpop.f32.mrf.mxu1 }
 0x135   : > { %807 = vst [vmem:[%s1538_s24 + $0x10] sm:$0xf] %v1103_v49  ;;  %815 = vst [vmem:[%s1538_s24 + $0x50] sm:$0xf] %v1111_v50  ;;  %v728_v56 = vmax.f32 %v712_v51, 0.0  ;;  %v1120_v58 = vpack.c.bf16 %v550_v53, %v550_v53  ;;  %v1128_v59 = vpack.c.bf16 %v590_v54, %v590_v54 }
 0x136   : > { %v736_v57 = vmax.f32 %v720_v52, 0.0  ;;  %v554_v60 = vpop.f32.mrf.mxu0  ;;  %v594_v61 = vpop.f32.mrf.mxu1 }
 0x137   : > { %v1104_v62 = vpack.c.bf16 %v728_v56, %v728_v56  ;;  %888 = vst [vmem:[%s1538_s24 + $0x1c] sm:$0xf] %v1120_v58  ;;  %896 = vst [vmem:[%s1538_s24 + $0x5c] sm:$0xf] %v1128_v59  ;;  %v713_v0 = vmul.f32 %v1527_v5, %v554_v60  ;;  %v721_v1 = vmul.f32 %v692_v55, %v594_v61  ;;  %v707_v32 = vpop.permute.xlu1 %706 }
 0x138   : > { %v1112_v63 = vpack.c.bf16 %v736_v57, %v736_v57  ;;  %v556_v2 = vpop.f32.mrf.mxu0  ;;  %v596_v3 = vpop.f32.mrf.mxu1 }
 0x139   : > { %808 = vst [vmem:[%s1538_s24 + $0x18] sm:$0xf] %v1104_v62  ;;  %v729_v9 = vmax.f32 %v713_v0, 0.0  ;;  %v737_v10 = vmax.f32 %v721_v1, 0.0  ;;  %v1121_v11 = vpack.c.bf16 %v556_v2, %v556_v2  ;;  %v1129_v12 = vpack.c.bf16 %v596_v3, %v596_v3 }
 0x13a   : > { %816 = vst [vmem:[%s1538_s24 + $0x58] sm:$0xf] %v1112_v63  ;;  %v558_v13 = vpop.f32.mrf.mxu0  ;;  %v598_v14 = vpop.f32.mrf.mxu1 }
 0x13b   : > { %v1105_v15 = vpack.c.bf16 %v729_v9, %v729_v9  ;;  %v1113_v16 = vpack.c.bf16 %v737_v10, %v737_v10  ;;  %889 = vst [vmem:[%s1538_s24 + $0x24] sm:$0xf] %v1121_v11  ;;  %897 = vst [vmem:[%s1538_s24 + $0x64] sm:$0xf] %v1129_v12  ;;  %v714_v5 = vmul.f32 %v1529_v6, %v558_v13 }
 0x13c   : > { %v722_v17 = vmul.f32 %v697_v4, %v598_v14  ;;  %v560_v18 = vpop.f32.mrf.mxu0  ;;  %v600_v19 = vpop.f32.mrf.mxu1 }
 0x13d   : > { %809 = vst [vmem:[%s1538_s24 + $0x20] sm:$0xf] %v1105_v15  ;;  %817 = vst [vmem:[%s1538_s24 + $0x60] sm:$0xf] %v1113_v16  ;;  %v730_v21 = vmax.f32 %v714_v5, 0.0  ;;  %v1122_v23 = vpack.c.bf16 %v560_v18, %v560_v18  ;;  %v1130_v24 = vpack.c.bf16 %v600_v19, %v600_v19 }
 0x13e   : > { %v738_v22 = vmax.f32 %v722_v17, 0.0  ;;  %v564_v25 = vpop.f32.mrf.mxu0  ;;  %v604_v26 = vpop.f32.mrf.mxu1 }
 0x13f   : > { %v1106_v27 = vpack.c.bf16 %v730_v21, %v730_v21  ;;  %890 = vst [vmem:[%s1538_s24 + $0x2c] sm:$0xf] %v1122_v23  ;;  %898 = vst [vmem:[%s1538_s24 + $0x6c] sm:$0xf] %v1130_v24  ;;  %v715_v6 = vmul.f32 %v1531_v7, %v564_v25  ;;  %v723_v29 = vmul.f32 %v702_v20, %v604_v26 }
 0x140   : > { %v1114_v28 = vpack.c.bf16 %v738_v22, %v738_v22  ;;  %v566_v30 = vpop.f32.mrf.mxu0  ;;  %v606_v31 = vpop.f32.mrf.mxu1 }
 0x141   : > { %810 = vst [vmem:[%s1538_s24 + $0x28] sm:$0xf] %v1106_v27  ;;  %v731_v33 = vmax.f32 %v715_v6, 0.0  ;;  %v739_v34 = vmax.f32 %v723_v29, 0.0  ;;  %v1123_v35 = vpack.c.bf16 %v566_v30, %v566_v30  ;;  %v1131_v36 = vpack.c.bf16 %v606_v31, %v606_v31 }
 0x142   : > { %818 = vst [vmem:[%s1538_s24 + $0x68] sm:$0xf] %v1114_v28  ;;  %v568_v37 = vpop.f32.mrf.mxu0  ;;  %v608_v38 = vpop.f32.mrf.mxu1 }
 0x143   : > { %v1107_v39 = vpack.c.bf16 %v731_v33, %v731_v33  ;;  %v1115_v40 = vpack.c.bf16 %v739_v34, %v739_v34  ;;  %891 = vst [vmem:[%s1538_s24 + $0x34] sm:$0xf] %v1123_v35  ;;  %899 = vst [vmem:[%s1538_s24 + $0x74] sm:$0xf] %v1131_v36  ;;  %v716_v7 = vmul.f32 %v1534_v8, %v568_v37 }
 0x144   : > { %v724_v41 = vmul.f32 %v707_v32, %v608_v38  ;;  %v570_v42 = vpop.f32.mrf.mxu0  ;;  %v610_v43 = vpop.f32.mrf.mxu1 }
 0x145   : > { %811 = vst [vmem:[%s1538_s24 + $0x30] sm:$0xf] %v1107_v39  ;;  %819 = vst [vmem:[%s1538_s24 + $0x70] sm:$0xf] %v1115_v40  ;;  %v732_v44 = vmax.f32 %v716_v7, 0.0  ;;  %v1124_v46 = vpack.c.bf16 %v570_v42, %v570_v42  ;;  %v1132_v47 = vpack.c.bf16 %v610_v43, %v610_v43 }
 0x146   : > { %v740_v45 = vmax.f32 %v724_v41, 0.0 }
 0x147   : > { %v1108_v8 = vpack.c.bf16 %v732_v44, %v732_v44  ;;  %892 = vst [vmem:[%s1538_s24 + $0x3c] sm:$0xf] %v1124_v46  ;;  %900 = vst [vmem:[%s1538_s24 + $0x7c] sm:$0xf] %v1132_v47 }
 0x148   : > { %v1116_v48 = vpack.c.bf16 %v740_v45, %v740_v45 }
 0x149   : > { %812 = vst [vmem:[%s1538_s24 + $0x38] sm:$0xf] %v1108_v8 }
 0x14a   : > { %820 = vst [vmem:[%s1538_s24 + $0x78] sm:$0xf] %v1116_v48 }
 0x14b   : > { %1335 = shalt.err (!%p1332_p0)
}
 0x14c   : > { %s1336_s7 = scalar_lea.hbm %s1577_s29, 2048  ;;  %s1340_s10 = scalar_lea.hbm %s1630_s3, 6144 }
 0x14d   : > { %p1337_p1 = scmp.ne.s32.totalorder %s1577_s29, %s1336_s7  ;;  %p1341_p4 = scmp.lt.s32.totalorder %s1577_s29, %s1630_s3 }
 0x14e   : > { %p1342_p7 = scmp.lt.s32.totalorder %s1340_s10, %s1336_s7 }
 0x14f   : > { %p1338_p2 = pnand %p1337_p1, %p1453_p5 }
 0x150   : > { %p1343_p6 = por %p1342_p7, %p1341_p4 }
 0x151   : > { %p1339_p3 = pneg %p1338_p2 }
 0x153   : > { %p1344_p8 = pnand %p1343_p6, %p1339_p3 }
 0x155   : > { %1347 = shalt.err (!%p1344_p8)
}
 0x156   : > { %s1393_s19 = smov 128   ;;  %s1394_s20 = smov 8  }
 0x157   : > { %1171 = dma.vmem_to_hbm [thread:$0]  (%p1453_p5), %s1579_s26, 2048, %s1577_s29, %s1587_s16, %s1393_s19, %s1393_s19, %s1394_s20  }
 0x158 PF: > { %p1183_p9 = scmp.ge.s32.totalorder %s1386_s15, 2  ;;  %s931_s24 = sand.u32 1, %s1374_s12  }
 0x159   : > { %p1634_p10 = scmp.ne.s32.totalorder %s1632_s23, 0  ;;  %s932_s25 = scalar_lea.sflag [#allocation4], %s931_s24 }
 0x15b   : > { %p1178_p11 = pnand %p1183_p9, %p1634_p10 }
 0x15d   : > { %p1179_p12 = pneg %p1178_p11 }
 0x15f   : > { %1369 = dma.done.wait (%p1179_p12), %s932_s25, 2048  }
 0x160   : > { %1371 = vsyncadd (%p1179_p12), %s932_s25, 4294965248  ;;  %p14_p13 = scmp.ge.s32.totalorder %s1440_s18, 5   ;;  %s1635_s12 = smov %s1378_s13 }
 0x161   : > { %s1636_s13 = smov %s1382_s14  ;;  %s1637_s14 = smov %s1451_s21 }
 0x162   : > { %s1638_s15 = smov %s1440_s18  ;;  %16 = sbr.rel (!%p14_p13) target bundleno = 4 (0x4), region = 75 }
 0x167   :  { %937 = vsyncpa [#allocation3], 1 }
 0x168   :  { %939 = vsyncpa [#allocation3 + $0x1], 1 }
 0x169   :  { %940 = vsyncpa [#allocation4], 1 }
 0x16a   :  { %942 = vsyncpa [#allocation4 + $0x1], 1 }

</bundles_post_ra>
